<compile_context>
chip_gen: v5e
topology: v5e:2x2
jax: 0.10.0
libtpu: 0.0.40
codegen_flags: <defaults>
</compile_context>

<pallas_src>
import functools

import jax
import jax.numpy as jnp
from jax import lax
from jax.experimental import pallas as pl
from jax.experimental.pallas import tpu as pltpu


def _conv_bn_relu_kernel(x_ref, w_ref, shift_ref, o_ref, *, K, pad, L, matmul_dtype):
    """One lane tile of NB packed batch elements (NCL layout, L*NB on the lane axis).

    x_ref:     (C_in, TL)        TL = NB*L; tile boundaries coincide with element boundaries
    w_ref:     (K, C_out, C_in)  conv weight, tap-major, BN scale folded in, matmul dtype
    shift_ref: (C_out, 1)        folded shift = (conv_bias - running_mean) * scale + beta
    o_ref:     (C_out, TL)
    """
    x = x_ref[...].astype(matmul_dtype)                     # single cast per block
    C_in, TL = x.shape
    C_out = o_ref.shape[0]

    # Local position of every lane inside its packed batch element (TL % L == 0 by construction).
    lane = lax.broadcasted_iota(jnp.int32, (C_in, TL), 1)
    local = lane % L

    acc = jnp.zeros((C_out, TL), jnp.float32)
    for t in range(K):                                      # K small & static -> unrolled
        d = t - pad                                         # tap offset w.r.t. output position
        if d == 0:
            xs = x
        else:
            # xs[:, p] = x[:, (p + d) % TL] via the XLU, then zero every lane whose true
            # neighbour lies outside its own element: that emulates the conv's zero padding
            # and simultaneously kills the roll's cross-element / cross-tile wrap-around.
            xs = pltpu.roll(x, shift=(-d) % TL, axis=1)
            valid = (local >= -d) if d < 0 else (local < L - d)   # one compare per tap
            xs = jnp.where(valid, xs, jnp.zeros_like(xs))
        # Lane-dense MXU matmul: (C_out, C_in) @ (C_in, TL) -> (C_out, TL).
        acc = acc + jnp.dot(w_ref[t], xs, preferred_element_type=jnp.float32)

    # Folded BN/bias shift + ReLU epilogue, kept in f32 (v5e VPU has no bf16).
    o_ref[...] = jnp.maximum(acc + shift_ref[...], 0.0).astype(o_ref.dtype)


def _choose_batch_pack(N, L, lane_target=1024):
    """Pick NB (batch elements packed per lane tile).

    Requirements: NB | N (no ragged tiles) and NB*L either a multiple of 128 (legal tiled
    BlockSpec, lane-dense stores) or NB == N (block == full array dims, always legal).
    Prefer enough grid steps to pipeline / feed both v7x TensorCores when possible.
    """
    divisors = [nb for nb in range(1, N + 1) if N % nb == 0]
    good = [nb for nb in divisors if (nb * L) % 128 == 0 and nb * L <= max(lane_target, 128)]
    if good:
        pipelined = [nb for nb in good if N // nb >= 4]     # >=2 steps per TC on v7x
        return max(pipelined) if pipelined else max(good)
    return N                                                # fall back to one full block


def basic1d_block_pallas(x_ncl, weight, bias, gamma, beta, run_mean, run_var,
                         eps=1e-5, matmul_dtype=jnp.float32, out_dtype=jnp.float32,
                         lane_target=1024):
    """x_ncl: (N, C_in, L) float32.  weight: (C_out, C_in, K) (PyTorch Conv1d layout).
    Returns (N, C_out, L) in out_dtype.  Conv1d('same', odd K) -> BN1d(eval) -> ReLU."""
    N, C_in, L = x_ncl.shape
    C_out, _, K = weight.shape
    if K % 2 != 1:
        # TODO(synk): even kernel_size gives L_out = L - 1 with PyTorch padding=(K-1)//2;
        # only the odd-K 'same' case is implemented here.
        raise NotImplementedError("basic1d_block_pallas assumes odd kernel_size")
    pad = (K - 1) // 2

    # --- Parameter-side folding (negligible vs. activation traffic). ---------------------
    scale = gamma / jnp.sqrt(run_var + eps)                                  # (C_out,)
    shift = (bias - run_mean) * scale + beta                                 # (C_out,)
    # Fold the BN scale into the conv weights -> epilogue is just acc + shift.
    w_folded = weight.astype(jnp.float32) * scale[:, None, None]             # (C_out, C_in, K)
    w_tap_major = jnp.transpose(w_folded, (2, 0, 1)).astype(matmul_dtype)    # (K, C_out, C_in)
    shift2d = shift.reshape(C_out, 1).astype(jnp.float32)

    # --- Pack batch along the lane axis: (N, C_in, L) -> (C_in, N*L). --------------------
    x_packed = jnp.transpose(x_ncl.astype(jnp.float32), (1, 0, 2)).reshape(C_in, N * L)

    NB = _choose_batch_pack(N, L, lane_target)
    TL = NB * L
    grid = (N // NB,)

    # VMEM budget derived from the blocks actually used (double-buffered in/out + params),
    # with headroom, clamped to 48 MiB so it stays valid on v7x's 64 MiB physical VMEM.
    block_bytes = (2 * C_in * TL + 2 * C_out * TL + K * C_out * C_in + 2 * C_out) * 4
    vmem_limit = int(min(48 * 1024 * 1024, max(16 * 1024 * 1024, 4 * block_bytes)))

    kernel = functools.partial(_conv_bn_relu_kernel, K=K, pad=pad, L=L,
                               matmul_dtype=matmul_dtype)

    out_packed = pl.pallas_call(
        kernel,
        out_shape=jax.ShapeDtypeStruct((C_out, N * L), out_dtype),
        grid=grid,
        in_specs=[
            pl.BlockSpec((C_in, TL), lambda i: (0, i)),
            pl.BlockSpec((K, C_out, C_in), lambda i: (0, 0, 0)),
            pl.BlockSpec((C_out, 1), lambda i: (0, 0)),
        ],
        out_specs=pl.BlockSpec((C_out, TL), lambda i: (0, i)),
        compiler_params=pltpu.CompilerParams(
            dimension_semantics=("parallel",),
            vmem_limit_bytes=vmem_limit,
        ),
    )(x_packed, w_tap_major, shift2d)

    # Back to PyTorch's NCL layout (pure layout plumbing on the lane-dense result).
    return out_packed.reshape(C_out, N, L).transpose(1, 0, 2)


def basic1d_block_ref(x_ncl, weight, bias, gamma, beta, run_mean, run_var, eps=1e-5):
    """Pure-JAX reference: Conv1d + eval-mode BN1d + ReLU, NCL layout."""
    K = weight.shape[2]
    pad = (K - 1) // 2
    y = lax.conv_general_dilated(
        x_ncl, weight,
        window_strides=(1,),
        padding=[(pad, pad)],
        dimension_numbers=("NCH", "OIH", "NCH"),
    )
    y = y + bias[None, :, None]
    y = (y - run_mean[None, :, None]) / jnp.sqrt(run_var[None, :, None] + eps)
    y = y * gamma[None, :, None] + beta[None, :, None]
    return jnp.maximum(y, 0.0)


if __name__ == "__main__":
    # Small shapes consistent with Basic1DBlock(in_planes=4, out_planes=8, kernel_size=3)
    N, C_in, C_out, L, K = 2, 4, 8, 16, 3

    key = jax.random.PRNGKey(0)
    k1, k2, k3, k4, k5, k6, k7 = jax.random.split(key, 7)

    x = jax.random.normal(k1, (N, C_in, L), dtype=jnp.float32)

    # Deterministic synthetic parameters (shapes from the module's __init__)
    weight = 0.1 * jax.random.normal(k2, (C_out, C_in, K), dtype=jnp.float32)  # Conv1d weight
    bias = 0.1 * jax.random.normal(k3, (C_out,), dtype=jnp.float32)            # Conv1d bias
    gamma = 1.0 + 0.1 * jax.random.normal(k4, (C_out,), dtype=jnp.float32)     # BN weight
    beta = 0.1 * jax.random.normal(k5, (C_out,), dtype=jnp.float32)            # BN bias
    run_mean = 0.1 * jax.random.normal(k6, (C_out,), dtype=jnp.float32)        # BN running_mean
    run_var = 1.0 + 0.1 * jnp.abs(jax.random.normal(k7, (C_out,), dtype=jnp.float32))  # BN running_var

    out = basic1d_block_pallas(x, weight, bias, gamma, beta, run_mean, run_var)
    out = jax.block_until_ready(out)

    ref = basic1d_block_ref(x, weight, bias, gamma, beta, run_mean, run_var)
    assert out.shape == (N, C_out, L)
    assert jnp.allclose(out, ref, atol=1e-4, rtol=1e-4), "mismatch vs JAX reference"

    print("KERNEL_OK")
</pallas_src>

<mosaic_0001>
module attributes {stable_mosaic.version = 11 : i64} {
  func.func @_conv_bn_relu_kernel(%arg0: i32, %arg1: memref<4x32xf32, #tpu.memory_space<vmem>>, %arg2: memref<3x8x4xf32, #tpu.memory_space<vmem>>, %arg3: memref<8x1xf32, #tpu.memory_space<vmem>>, %arg4: memref<8x32xf32, #tpu.memory_space<vmem>>) attributes {dimension_semantics = [#tpu.dimension_semantics<parallel>], iteration_bounds = array<i64: 1>, scalar_prefetch = 0 : i64, scratch_operands = 0 : i64, tpu.core_type = #tpu.core_type<tc>, window_params = [{transform_indices = @transform_0, window_bounds = array<i64: 4, 32>}, {pipeline_mode = #tpu.pipeline_mode<synchronous>, transform_indices = @transform_1, window_bounds = array<i64: 3, 8, 4>}, {pipeline_mode = #tpu.pipeline_mode<synchronous>, transform_indices = @transform_2, window_bounds = array<i64: 8, 1>}, {transform_indices = @transform_3, window_bounds = array<i64: 8, 32>}]} {
    %c0 = arith.constant 0 : index
    %c0_0 = arith.constant 0 : index
    %0 = vector.load %arg1[%c0, %c0_0] : memref<4x32xf32, #tpu.memory_space<vmem>>, vector<4x32xf32>
    %1 = tpu.iota {dimensions = array<i32: 1>} : vector<4x32xi32>
    %c16_i32 = arith.constant 16 : i32
    %c0_i32 = arith.constant 0 : i32
    %2 = arith.cmpi eq, %c16_i32, %c0_i32 : i32
    %c1_i32 = arith.constant 1 : i32
    %3 = arith.select %2, %c1_i32, %c16_i32 : i32
    %4 = vector.broadcast %3 : i32 to vector<4x32xi32>
    %5 = arith.remsi %1, %4 : vector<4x32xi32>
    %c0_i32_1 = arith.constant 0 : i32
    %6 = vector.broadcast %c0_i32_1 : i32 to vector<4x32xi32>
    %7 = arith.cmpi ne, %5, %6 : vector<4x32xi32>
    %c0_i32_2 = arith.constant 0 : i32
    %8 = vector.broadcast %c0_i32_2 : i32 to vector<4x32xi32>
    %9 = arith.cmpi slt, %5, %8 : vector<4x32xi32>
    %c0_i32_3 = arith.constant 0 : i32
    %10 = arith.cmpi slt, %3, %c0_i32_3 : i32
    %11 = vector.broadcast %10 : i1 to vector<4x32xi1>
    %12 = vector.broadcast %11 : vector<4x32xi1> to vector<4x32xi1>
    %13 = arith.xori %9, %12 : vector<4x32xi1>
    %14 = arith.andi %13, %7 : vector<4x32xi1>
    %15 = vector.broadcast %3 : i32 to vector<4x32xi32>
    %16 = arith.addi %5, %15 : vector<4x32xi32>
    %17 = arith.select %14, %16, %5 : vector<4x32xi1>, vector<4x32xi32>
    %cst = arith.constant 0.000000e+00 : f32
    %18 = vector.broadcast %cst : f32 to vector<8x32xf32>
    %c1_i32_4 = arith.constant 1 : i32
    %19 = tpu.dynamic_rotate %0 by %c1_i32_4 dim 1 : vector<4x32xf32>, i32 -> vector<4x32xf32>
    %c1_i32_5 = arith.constant 1 : i32
    %20 = vector.broadcast %c1_i32_5 : i32 to vector<4x32xi32>
    %21 = arith.cmpi sge, %17, %20 : vector<4x32xi32>
    %cst_6 = arith.constant 0.000000e+00 : f32
    %22 = vector.broadcast %cst_6 : f32 to vector<4x32xf32>
    %23 = arith.select %21, %19, %22 : vector<4x32xi1>, vector<4x32xf32>
    %c0_7 = arith.constant 0 : index
    %c0_8 = arith.constant 0 : index
    %c0_9 = arith.constant 0 : index
    %24 = vector.load %arg2[%c0_7, %c0_8, %c0_9] : memref<3x8x4xf32, #tpu.memory_space<vmem>>, vector<1x8x4xf32>
    %25 = vector.shape_cast %24 : vector<1x8x4xf32> to vector<8x4xf32>
    %cst_10 = arith.constant dense<0.000000e+00> : vector<8x32xf32>
    %26 = tpu.matmul %25, %23, %cst_10 {dimension_numbers = #tpu.dot_dimension_numbers<[1], [0], [0], [1], [0, 0, 1, 1], [], []>} : vector<8x4xf32>, vector<4x32xf32>, vector<8x32xf32> -> vector<8x32xf32>
    %27 = arith.addf %18, %26 : vector<8x32xf32>
    %c1 = arith.constant 1 : index
    %c0_11 = arith.constant 0 : index
    %c0_12 = arith.constant 0 : index
    %28 = vector.load %arg2[%c1, %c0_11, %c0_12] : memref<3x8x4xf32, #tpu.memory_space<vmem>>, vector<1x8x4xf32>
    %29 = vector.shape_cast %28 : vector<1x8x4xf32> to vector<8x4xf32>
    %cst_13 = arith.constant dense<0.000000e+00> : vector<8x32xf32>
    %30 = tpu.matmul %29, %0, %cst_13 {dimension_numbers = #tpu.dot_dimension_numbers<[1], [0], [0], [1], [0, 0, 1, 1], [], []>} : vector<8x4xf32>, vector<4x32xf32>, vector<8x32xf32> -> vector<8x32xf32>
    %31 = arith.addf %27, %30 : vector<8x32xf32>
    %c31_i32 = arith.constant 31 : i32
    %32 = tpu.dynamic_rotate %0 by %c31_i32 dim 1 : vector<4x32xf32>, i32 -> vector<4x32xf32>
    %c15_i32 = arith.constant 15 : i32
    %33 = vector.broadcast %c15_i32 : i32 to vector<4x32xi32>
    %34 = arith.cmpi slt, %17, %33 : vector<4x32xi32>
    %cst_14 = arith.constant 0.000000e+00 : f32
    %35 = vector.broadcast %cst_14 : f32 to vector<4x32xf32>
    %36 = arith.select %34, %32, %35 : vector<4x32xi1>, vector<4x32xf32>
    %c2 = arith.constant 2 : index
    %c0_15 = arith.constant 0 : index
    %c0_16 = arith.constant 0 : index
    %37 = vector.load %arg2[%c2, %c0_15, %c0_16] : memref<3x8x4xf32, #tpu.memory_space<vmem>>, vector<1x8x4xf32>
    %38 = vector.shape_cast %37 : vector<1x8x4xf32> to vector<8x4xf32>
    %cst_17 = arith.constant dense<0.000000e+00> : vector<8x32xf32>
    %39 = tpu.matmul %38, %36, %cst_17 {dimension_numbers = #tpu.dot_dimension_numbers<[1], [0], [0], [1], [0, 0, 1, 1], [], []>} : vector<8x4xf32>, vector<4x32xf32>, vector<8x32xf32> -> vector<8x32xf32>
    %40 = arith.addf %31, %39 : vector<8x32xf32>
    %c0_18 = arith.constant 0 : index
    %c0_19 = arith.constant 0 : index
    %41 = vector.load %arg3[%c0_18, %c0_19] : memref<8x1xf32, #tpu.memory_space<vmem>>, vector<8x1xf32>
    %42 = vector.broadcast %41 : vector<8x1xf32> to vector<8x32xf32>
    %43 = arith.addf %40, %42 : vector<8x32xf32>
    %cst_20 = arith.constant 0.000000e+00 : f32
    %44 = vector.broadcast %cst_20 : f32 to vector<8x32xf32>
    %45 = arith.maximumf %43, %44 : vector<8x32xf32>
    %c0_21 = arith.constant 0 : index
    %c0_22 = arith.constant 0 : index
    %46 = vector.load %arg4[%c0_21, %c0_22] : memref<8x32xf32, #tpu.memory_space<vmem>>, vector<8x32xf32>
    tpu.vector_store %arg4[%c0_21, %c0_22], %45 {strides = array<i32>} : memref<8x32xf32, #tpu.memory_space<vmem>>, vector<8x32xf32>,
    return
  }
  func.func @transform_0(%arg0: i32) -> (i32, i32) {
    %c0_i32 = arith.constant 0 : i32
    %c0_i32_0 = arith.constant 0 : i32
    return %c0_i32, %arg0 : i32, i32
  }
  func.func @transform_1(%arg0: i32) -> (i32, i32, i32) {
    %c0_i32 = arith.constant 0 : i32
    %c0_i32_0 = arith.constant 0 : i32
    %c0_i32_1 = arith.constant 0 : i32
    %c0_i32_2 = arith.constant 0 : i32
    return %c0_i32, %c0_i32_0, %c0_i32_1 : i32, i32, i32
  }
  func.func @transform_2(%arg0: i32) -> (i32, i32) {
    %c0_i32 = arith.constant 0 : i32
    %c0_i32_0 = arith.constant 0 : i32
    %c0_i32_1 = arith.constant 0 : i32
    return %c0_i32, %c0_i32_0 : i32, i32
  }
  func.func @transform_3(%arg0: i32) -> (i32, i32) {
    %c0_i32 = arith.constant 0 : i32
    %c0_i32_0 = arith.constant 0 : i32
    return %c0_i32, %arg0 : i32, i32
  }
}

</mosaic_0001>

<bundles_post_ra>
// kernel: tpu_custom_call.1
= control target key start
LH: loop header
LB: loop body
LE: loop exit
PB: predicated region body
PF: predicated region fallthrough
CT: control target
= control target key end

     0   :  { %s250_s0 = inlined_call_operand.vmem [shape: f32[4,32], index: 0, kind: input, shape index: {}]   ;;  %s251_s1 = inlined_call_operand.vmem [shape: f32[3,8,4], index: 1, kind: input, shape index: {}]   ;;  %s252_s2 = inlined_call_operand.vmem [shape: f32[8,1], index: 2, kind: input, shape index: {}]   ;;  %s253_s3 = inlined_call_operand.hbm [shape: f32[8,32], index: 3, kind: output, shape index: {}]  }
   0x1   :  { %v15_v0 = vld [vmem:[%s250_s0] sm:$0xf] }
   0x2   :  { %8 = vsyncpa [#allocation3], 0  ;;  %s201_s14 = smov 32   ;;  %vm30_vm0 = vcmask 1047808   ;;  %s202_s15 = smov 127   ;;  %vm50_vm1 = vcmask 1043456   ;;  %v16_v8 = vlaneseq }
   0x3   :  { %31 = vrot.lane.b32.xlu0 %v15_v0, %s201_s14  ;;  %s203_s16 = smov 97   ;;  %161 = vmatpush.msk.msra.mxu0 %vm50_vm1, %v15_v0  ;;  %vm46_vm2 = vcmask 31744   ;;  %v160_v5 = vld [vmem:[%s251_s1 + $0x8] sm:$0xff]  ;;  %v134_v6 = vld [vmem:[%s252_s2] sm:$0xff]  ;;  %v204_v7 = vmov 0   ;;  %v165_v12 = vld [vmem:[%s251_s1 + $0x10] sm:$0xff] }
   0x4   :  { %162 = vmatmul.msk.f32.vlgmr.msra.gmra.mxu0 %vm46_vm2, %v160_v5  ;;  %173 = vset.pattern.permute.xlu2 %v204_v7  ;;  %v17_v9 = vand.u32 127, %v16_v8  ;;  %v43_v15 = vld [vmem:[%s251_s1] sm:$0xff]  ;;  %s205_s23 = smov [#allocation2]   ;;  %s151_s27 = sshll.u32 %s253_s3, 4  ;;  %vm142_vm5 = vcmask 261120   ;;  %s152_s27 = int_to_ptr.hbm [resolvable:$true] %s151_s27 }
   0x5   :  { %174 = vset.pattern.permute.xlu0 %v204_v7  ;;  %137 = vperm.xlu2 %173, %v134_v6   ;;  %s149_s24 = sshll.u32 %s205_s23, 4  ;;  %s150_s24 = int_to_ptr.vmem [resolvable:$true] %s149_s24 }
   0x6   :  { %v22_v10 = vand.u32 15, %v17_v9 }
   0x8   :  { %vm100_vm3 = vcmp.lt.s32.totalorder %v22_v10, 15  ;;  %vm37_vm4 = vcmp.ge.s32.totalorder %v22_v10, 1 }
  0x5f   :  { %v138_v21 = vpop.permute.xlu2 %137 }
  0x75   :  { %v32_v1 = vpop.permute.xlu0 %31 }
  0x76   :  { %v33_v2 = vsel %vm30_vm0, %v32_v1, %v15_v0 }
  0x77   :  { %34 = vrot.lane.b32.xlu0 %v33_v2, %s201_s14 }
  0x81   :  { %v71_v17 = vpop.f32.mrf.mxu0 }
  0xe9   :  { %v35_v3 = vpop.permute.xlu0 %34 }
  0xea   :  { %v36_v4 = vsel %vm30_vm0, %v35_v3, %v15_v0 }
  0xeb   :  { %101 = vrot.lane.b32.xlu1 %v36_v4, %s202_s15 }
  0xf3   :  { %39 = vrot.lane.b32.xlu1 %v36_v4, %s203_s16 }
 0x15d   :  { %v102_v11 = vpop.permute.xlu1 %101 }
 0x15e   :  { %v104_v13 = vsel %vm100_vm3, %v102_v11, 0.0 }
 0x15f   :  { %166 = vmatpush.msk.msra.mxu2 %vm50_vm1, %v104_v13 }
 0x160   :  { %167 = vmatmul.msk.f32.vlgmr.msra.gmra.mxu2 %vm46_vm2, %v165_v12 }
 0x165   :  { %v40_v14 = vpop.permute.xlu1 %39 }
 0x166   :  { %v42_v16 = vsel %vm37_vm4, %v40_v14, 0.0 }
 0x167   :  { %163 = vmatpush.msk.msra.mxu1 %vm50_vm1, %v42_v16 }
 0x168   :  { %164 = vmatmul.msk.f32.vlgmr.msra.gmra.mxu1 %vm46_vm2, %v43_v15 }
 0x1e3   :  { %v130_v19 = vpop.f32.mrf.mxu2 }
 0x1e5   :  { %v97_v18 = vpop.f32.mrf.mxu1 }
 0x1e6   :  { %v98_v20 = vadd.f32 %v97_v18, %v71_v17 }
 0x1e8   :  { %v133_v22 = vadd.f32 %v130_v19, %v98_v20 }
 0x1ea   :  { %v140_v23 = vadd.f32 %v138_v21, %v133_v22 }
 0x1ec   :  { %v141_v24 = vmax.f32 %v140_v23, 0.0 }
 0x1ee   :  { %143 = vst.msk [vmem:[#allocation2] sm:$0xff] %vm142_vm5, %v141_v24 }
 0x1ef   :  { %154 = dma.vmem_to_hbm [thread:$0]  %s150_s24, 128, %s152_s27, [#allocation3]  }
 0x1f0   :  { %199 = dma.done.wait [#allocation3], 128  }
 0x1f1   :  { %200 = vsyncadd [#allocation3], 4294967168 }
 0x1f2   :  { %159 = vsyncpa [#allocation3], 1 }

</bundles_post_ra>
